<compile_context>
chip_gen: v6e
topology: v6e:2x2x1
jax: 0.10.0
libtpu: 0.0.40
codegen_flags: <defaults>
</compile_context>

<pallas_src>
import jax
import jax.numpy as jnp
from jax.experimental import pallas as pl
from jax.experimental.pallas import tpu as pltpu


def agcn_kernel(sflat_ref, x_ref, w_wide_ref, bias_ref, out_ref):
    """One grid step == TB batch elements; supports/weights/bias stay resident.

    sflat_ref : [N, K*N]         horizontally stacked Chebyshev supports
    x_ref     : [TB, N, C_in]    this step's batch tile of node features
    w_wide_ref: [C_in, K*C_out]  per-support weight blocks stacked along lanes
    bias_ref  : [1, C_out]       f32
    out_ref   : [N, TB*C_out]    per-batch results stacked along lanes
    """
    tb, n, c_in = x_ref.shape
    c_out = bias_ref.shape[-1]
    k = w_wide_ref.shape[-1] // c_out

    # (1) ONE feature matmul for all TB batches and all K supports: TB*N rows,
    #     K*C_out output lanes (K folded into the lanes of a single MXU pass).
    xf = x_ref[...].reshape(tb * n, c_in)          # leading-dim merge only
    y = jnp.dot(xf, w_wide_ref[...], preferred_element_type=jnp.float32)
    y = y.astype(x_ref.dtype)                      # bf16 fast path for matmul 2

    s = sflat_ref[...]
    bias = bias_ref[...]                           # [1, C_out], f32 epilogue

    # (2) Graph contraction via per-(b, k) MXU accumulation — replaces the old
    #     lane-slice + sublane-concat re-stack with plain dots; accumulation
    #     stays in f32.  out_b = sum_k S_k @ (x_b @ W_k).
    outs = []
    for b in range(tb):
        y_b = y[b * n:(b + 1) * n, :]              # aligned sublane slice (N % 8 == 0)
        acc = jnp.zeros((n, c_out), jnp.float32)
        for kk in range(k):
            acc = acc + jnp.dot(
                s[:, kk * n:(kk + 1) * n],             # S_k        [N, N]
                y_b[:, kk * c_out:(kk + 1) * c_out],   # x_b @ W_k  [N, C_out]
                preferred_element_type=jnp.float32)
        outs.append(acc + bias)

    # (3) Lane-stack the TB per-batch results -> [N, TB*C_out]; store becomes
    #     unmasked once TB*C_out >= 128.  Wrapper un-transposes to [B, N, C_out].
    out_ref[...] = jnp.concatenate(outs, axis=-1).astype(out_ref.dtype)


def build_support_stack(supports, cheb_k, n, dtype):
    """Chebyshev recursion (host-side glue): [I, S, 2*S@T_{k-1} - T_{k-2}, ...]."""
    eye = jnp.eye(n, dtype=dtype)
    support_set = []
    for s in supports:
        s = s.astype(dtype)
        ks = [eye, s]
        for _ in range(2, cheb_k):
            ks.append(2.0 * (s @ ks[-1]) - ks[-2])
        support_set.extend(ks)
    return jnp.stack(support_set, axis=0)  # [K, N, N], K = len(supports) * cheb_k


def _default_batch_tile(b):
    """Largest divisor of B that is <= 8 (review: TB>=4 v5e, >=8 v6e/v7x, capped by B)."""
    for t in range(min(b, 8), 0, -1):
        if b % t == 0:
            return t
    return 1


def agcn_forward(x, supports, weights, bias, cheb_k, *,
                 compute_dtype=jnp.bfloat16, batch_tile=None):
    B, N, C_in = x.shape
    C_out = weights.shape[-1]
    out_dtype = x.dtype

    tb = batch_tile or _default_batch_tile(B)
    assert B % tb == 0, "batch_tile must divide the batch size"
    G = B // tb

    # Chebyshev recursion in f32 (tiny sequential [N,N] matmuls), cast once after.
    supp_stack = build_support_stack(supports, cheb_k, N, jnp.float32)  # [K, N, N]
    K = supp_stack.shape[0]

    # S_flat[n, k*N + m] = S_k[n, m]   (horizontal stack of the K supports)
    s_flat = (jnp.transpose(supp_stack, (1, 0, 2))
              .reshape(N, K * N).astype(compute_dtype))
    # W_wide[c, k*C_out + o] = W_k[c, o]  (block-row view of [K*C_in, C_out] weights)
    w_wide = (weights.reshape(K, C_in, C_out)
              .transpose(1, 0, 2)
              .reshape(C_in, K * C_out)
              .astype(compute_dtype))
    bias2 = bias.reshape(1, C_out).astype(jnp.float32)
    x_c = x.astype(compute_dtype)

    # TODO(synk): for large graphs (N in the hundreds/thousands), single-buffer
    # the constant-index resident operands (pipeline_mode=pl.Buffered(1) on
    # s_flat / w_wide / bias), set vmem_limit_bytes explicitly, and add a
    # destination-row (or K*N-contraction + f32 accumulator) tiling axis once
    # K*N*N*bytes approaches the 16-32 MiB scoped-VMEM defaults (64 MiB physical
    # on v7x).  At these shapes everything fits in a few KiB of VMEM.
    out_wide = pl.pallas_call(
        agcn_kernel,
        out_shape=jax.ShapeDtypeStruct((G, N, tb * C_out), out_dtype),
        grid_spec=pltpu.PrefetchScalarGridSpec(
            num_scalar_prefetch=0,
            grid=(G,),  # one step per TB-batch tile (B=2 -> a single step)
            in_specs=[
                pl.BlockSpec((N, K * N), lambda g: (0, 0)),            # resident
                pl.BlockSpec((tb, N, C_in), lambda g: (g, 0, 0)),      # x batch tile
                pl.BlockSpec((C_in, K * C_out), lambda g: (0, 0)),     # resident
                pl.BlockSpec((1, C_out), lambda g: (0, 0)),            # resident
            ],
            out_specs=pl.BlockSpec((pl.Squeezed(), N, tb * C_out),
                                   lambda g: (g, 0, 0)),
        ),
        compiler_params=pltpu.CompilerParams(
            dimension_semantics=("parallel",)),  # v7x: TB-tiles split across TCs when G >= 2
    )(s_flat, x_c, w_wide, bias2)

    # Un-transpose the lane-stacked [N, TB*C_out] blocks back to [B, N, C_out]
    # (wrapper-side layout plumbing, per the perf review).
    out = (out_wide.reshape(G, N, tb, C_out)
           .transpose(0, 2, 1, 3)
           .reshape(B, N, C_out))
    return out


def agcn_ref(x, supports, weights, bias, cheb_k):
    """Pure-JAX reference mirroring the PyTorch forward exactly."""
    N = x.shape[1]
    supp_stack = build_support_stack(supports, cheb_k, N, x.dtype)
    x_g = jnp.concatenate(
        [jnp.einsum('nm,bmc->bnc', supp_stack[k], x)
         for k in range(supp_stack.shape[0])],
        axis=-1)
    return jnp.einsum('bni,io->bno', x_g, weights) + bias


if __name__ == "__main__":
    B, N, C_in, C_out, cheb_k = 2, 16, 4, 32, 3
    n_supports = 2  # weights shape (2 * cheb_k * dim_in, dim_out) implies 2 supports

    key = jax.random.PRNGKey(0)
    kx, ks1, ks2, kw = jax.random.split(key, 4)

    x = jax.random.normal(kx, (B, N, C_in), dtype=jnp.float32)
    # row-normalized random adjacencies as supports
    s1 = jax.nn.softmax(jax.random.normal(ks1, (N, N), dtype=jnp.float32), axis=-1)
    s2 = jax.nn.softmax(jax.random.normal(ks2, (N, N), dtype=jnp.float32), axis=-1)
    supports = [s1, s2]

    # xavier_normal_: std = sqrt(2 / (fan_in + fan_out))
    fan_in, fan_out = n_supports * cheb_k * C_in, C_out
    std = (2.0 / (fan_in + fan_out)) ** 0.5
    weights = std * jax.random.normal(kw, (fan_in, fan_out), dtype=jnp.float32)
    bias = jnp.zeros((C_out,), dtype=jnp.float32)

    ref = agcn_ref(x, supports, weights, bias, cheb_k)

    # Strict check on the f32 compute path (order-insensitive at 1e-4).
    out_f32 = jax.block_until_ready(
        agcn_forward(x, supports, weights, bias, cheb_k, compute_dtype=jnp.float32))
    assert out_f32.shape == (B, N, C_out)
    assert jnp.allclose(out_f32, ref, atol=1e-4, rtol=1e-4), "f32 mismatch vs reference"

    # Default bf16 fast path (f32 accumulation / epilogue): looser tolerance.
    out_bf16 = jax.block_until_ready(agcn_forward(x, supports, weights, bias, cheb_k))
    assert out_bf16.shape == (B, N, C_out)
    assert out_bf16.dtype == jnp.float32
    assert jnp.allclose(out_bf16, ref, atol=5e-2, rtol=5e-2), "bf16 mismatch vs reference"

    print("KERNEL_OK")
</pallas_src>

<mosaic_0001>
module attributes {stable_mosaic.version = 11 : i64} {
  func.func @agcn_kernel(%arg0: i32, %arg1: memref<16x96xf32, #tpu.memory_space<vmem>>, %arg2: memref<2x16x4xf32, #tpu.memory_space<vmem>>, %arg3: memref<4x192xf32, #tpu.memory_space<vmem>>, %arg4: memref<1x32xf32, #tpu.memory_space<vmem>>, %arg5: memref<1x16x64xf32, #tpu.memory_space<vmem>>) attributes {dimension_semantics = [#tpu.dimension_semantics<parallel>], iteration_bounds = array<i64: 1>, scalar_prefetch = 0 : i64, scratch_operands = 0 : i64, tpu.core_type = #tpu.core_type<tc>, window_params = [{pipeline_mode = #tpu.pipeline_mode<synchronous>, transform_indices = @transform_0, window_bounds = array<i64: 16, 96>}, {transform_indices = @transform_1, window_bounds = array<i64: 2, 16, 4>}, {pipeline_mode = #tpu.pipeline_mode<synchronous>, transform_indices = @transform_2, window_bounds = array<i64: 4, 192>}, {pipeline_mode = #tpu.pipeline_mode<synchronous>, transform_indices = @transform_3, window_bounds = array<i64: 1, 32>}, {transform_indices = @transform_4, window_bounds = array<i64: 1, 16, 64>}]} {
    %c0 = arith.constant 0 : index
    %c0_0 = arith.constant 0 : index
    %c0_1 = arith.constant 0 : index
    %0 = vector.load %arg2[%c0, %c0_0, %c0_1] : memref<2x16x4xf32, #tpu.memory_space<vmem>>, vector<2x16x4xf32>
    %1 = vector.shape_cast %0 : vector<2x16x4xf32> to vector<32x4xf32>
    %c0_2 = arith.constant 0 : index
    %c0_3 = arith.constant 0 : index
    %2 = vector.load %arg3[%c0_2, %c0_3] : memref<4x192xf32, #tpu.memory_space<vmem>>, vector<4x192xf32>
    %cst = arith.constant dense<0.000000e+00> : vector<32x192xf32>
    %3 = tpu.matmul %1, %2, %cst {dimension_numbers = #tpu.dot_dimension_numbers<[1], [0], [0], [1], [0, 0, 1, 1], [], []>} : vector<32x4xf32>, vector<4x192xf32>, vector<32x192xf32> -> vector<32x192xf32>
    %c0_4 = arith.constant 0 : index
    %c0_5 = arith.constant 0 : index
    %4 = vector.load %arg1[%c0_4, %c0_5] : memref<16x96xf32, #tpu.memory_space<vmem>>, vector<16x96xf32>
    %c0_6 = arith.constant 0 : index
    %c0_7 = arith.constant 0 : index
    %5 = vector.load %arg4[%c0_6, %c0_7] : memref<1x32xf32, #tpu.memory_space<vmem>>, vector<1x32xf32>
    %6 = vector.extract_strided_slice %3 {offsets = [0, 0], sizes = [16, 192], strides = [1, 1]} : vector<32x192xf32> to vector<16x192xf32>
    %cst_8 = arith.constant 0.000000e+00 : f32
    %7 = vector.broadcast %cst_8 : f32 to vector<16x32xf32>
    %8 = vector.extract_strided_slice %4 {offsets = [0, 0], sizes = [16, 16], strides = [1, 1]} : vector<16x96xf32> to vector<16x16xf32>
    %9 = vector.extract_strided_slice %6 {offsets = [0, 0], sizes = [16, 32], strides = [1, 1]} : vector<16x192xf32> to vector<16x32xf32>
    %cst_9 = arith.constant dense<0.000000e+00> : vector<16x32xf32>
    %10 = tpu.matmul %8, %9, %cst_9 {dimension_numbers = #tpu.dot_dimension_numbers<[1], [0], [0], [1], [0, 0, 1, 1], [], []>} : vector<16x16xf32>, vector<16x32xf32>, vector<16x32xf32> -> vector<16x32xf32>
    %11 = arith.addf %7, %10 : vector<16x32xf32>
    %12 = vector.extract_strided_slice %4 {offsets = [0, 16], sizes = [16, 16], strides = [1, 1]} : vector<16x96xf32> to vector<16x16xf32>
    %13 = vector.extract_strided_slice %6 {offsets = [0, 32], sizes = [16, 32], strides = [1, 1]} : vector<16x192xf32> to vector<16x32xf32>
    %cst_10 = arith.constant dense<0.000000e+00> : vector<16x32xf32>
    %14 = tpu.matmul %12, %13, %cst_10 {dimension_numbers = #tpu.dot_dimension_numbers<[1], [0], [0], [1], [0, 0, 1, 1], [], []>} : vector<16x16xf32>, vector<16x32xf32>, vector<16x32xf32> -> vector<16x32xf32>
    %15 = arith.addf %11, %14 : vector<16x32xf32>
    %16 = vector.extract_strided_slice %4 {offsets = [0, 32], sizes = [16, 16], strides = [1, 1]} : vector<16x96xf32> to vector<16x16xf32>
    %17 = vector.extract_strided_slice %6 {offsets = [0, 64], sizes = [16, 32], strides = [1, 1]} : vector<16x192xf32> to vector<16x32xf32>
    %cst_11 = arith.constant dense<0.000000e+00> : vector<16x32xf32>
    %18 = tpu.matmul %16, %17, %cst_11 {dimension_numbers = #tpu.dot_dimension_numbers<[1], [0], [0], [1], [0, 0, 1, 1], [], []>} : vector<16x16xf32>, vector<16x32xf32>, vector<16x32xf32> -> vector<16x32xf32>
    %19 = arith.addf %15, %18 : vector<16x32xf32>
    %20 = vector.extract_strided_slice %4 {offsets = [0, 48], sizes = [16, 16], strides = [1, 1]} : vector<16x96xf32> to vector<16x16xf32>
    %21 = vector.extract_strided_slice %6 {offsets = [0, 96], sizes = [16, 32], strides = [1, 1]} : vector<16x192xf32> to vector<16x32xf32>
    %cst_12 = arith.constant dense<0.000000e+00> : vector<16x32xf32>
    %22 = tpu.matmul %20, %21, %cst_12 {dimension_numbers = #tpu.dot_dimension_numbers<[1], [0], [0], [1], [0, 0, 1, 1], [], []>} : vector<16x16xf32>, vector<16x32xf32>, vector<16x32xf32> -> vector<16x32xf32>
    %23 = arith.addf %19, %22 : vector<16x32xf32>
    %24 = vector.extract_strided_slice %4 {offsets = [0, 64], sizes = [16, 16], strides = [1, 1]} : vector<16x96xf32> to vector<16x16xf32>
    %25 = vector.extract_strided_slice %6 {offsets = [0, 128], sizes = [16, 32], strides = [1, 1]} : vector<16x192xf32> to vector<16x32xf32>
    %cst_13 = arith.constant dense<0.000000e+00> : vector<16x32xf32>
    %26 = tpu.matmul %24, %25, %cst_13 {dimension_numbers = #tpu.dot_dimension_numbers<[1], [0], [0], [1], [0, 0, 1, 1], [], []>} : vector<16x16xf32>, vector<16x32xf32>, vector<16x32xf32> -> vector<16x32xf32>
    %27 = arith.addf %23, %26 : vector<16x32xf32>
    %28 = vector.extract_strided_slice %4 {offsets = [0, 80], sizes = [16, 16], strides = [1, 1]} : vector<16x96xf32> to vector<16x16xf32>
    %29 = vector.extract_strided_slice %6 {offsets = [0, 160], sizes = [16, 32], strides = [1, 1]} : vector<16x192xf32> to vector<16x32xf32>
    %cst_14 = arith.constant dense<0.000000e+00> : vector<16x32xf32>
    %30 = tpu.matmul %28, %29, %cst_14 {dimension_numbers = #tpu.dot_dimension_numbers<[1], [0], [0], [1], [0, 0, 1, 1], [], []>} : vector<16x16xf32>, vector<16x32xf32>, vector<16x32xf32> -> vector<16x32xf32>
    %31 = arith.addf %27, %30 : vector<16x32xf32>
    %32 = vector.broadcast %5 : vector<1x32xf32> to vector<16x32xf32>
    %33 = arith.addf %31, %32 : vector<16x32xf32>
    %34 = vector.extract_strided_slice %3 {offsets = [16, 0], sizes = [16, 192], strides = [1, 1]} : vector<32x192xf32> to vector<16x192xf32>
    %cst_15 = arith.constant 0.000000e+00 : f32
    %35 = vector.broadcast %cst_15 : f32 to vector<16x32xf32>
    %36 = vector.extract_strided_slice %4 {offsets = [0, 0], sizes = [16, 16], strides = [1, 1]} : vector<16x96xf32> to vector<16x16xf32>
    %37 = vector.extract_strided_slice %34 {offsets = [0, 0], sizes = [16, 32], strides = [1, 1]} : vector<16x192xf32> to vector<16x32xf32>
    %cst_16 = arith.constant dense<0.000000e+00> : vector<16x32xf32>
    %38 = tpu.matmul %36, %37, %cst_16 {dimension_numbers = #tpu.dot_dimension_numbers<[1], [0], [0], [1], [0, 0, 1, 1], [], []>} : vector<16x16xf32>, vector<16x32xf32>, vector<16x32xf32> -> vector<16x32xf32>
    %39 = arith.addf %35, %38 : vector<16x32xf32>
    %40 = vector.extract_strided_slice %4 {offsets = [0, 16], sizes = [16, 16], strides = [1, 1]} : vector<16x96xf32> to vector<16x16xf32>
    %41 = vector.extract_strided_slice %34 {offsets = [0, 32], sizes = [16, 32], strides = [1, 1]} : vector<16x192xf32> to vector<16x32xf32>
    %cst_17 = arith.constant dense<0.000000e+00> : vector<16x32xf32>
    %42 = tpu.matmul %40, %41, %cst_17 {dimension_numbers = #tpu.dot_dimension_numbers<[1], [0], [0], [1], [0, 0, 1, 1], [], []>} : vector<16x16xf32>, vector<16x32xf32>, vector<16x32xf32> -> vector<16x32xf32>
    %43 = arith.addf %39, %42 : vector<16x32xf32>
    %44 = vector.extract_strided_slice %4 {offsets = [0, 32], sizes = [16, 16], strides = [1, 1]} : vector<16x96xf32> to vector<16x16xf32>
    %45 = vector.extract_strided_slice %34 {offsets = [0, 64], sizes = [16, 32], strides = [1, 1]} : vector<16x192xf32> to vector<16x32xf32>
    %cst_18 = arith.constant dense<0.000000e+00> : vector<16x32xf32>
    %46 = tpu.matmul %44, %45, %cst_18 {dimension_numbers = #tpu.dot_dimension_numbers<[1], [0], [0], [1], [0, 0, 1, 1], [], []>} : vector<16x16xf32>, vector<16x32xf32>, vector<16x32xf32> -> vector<16x32xf32>
    %47 = arith.addf %43, %46 : vector<16x32xf32>
    %48 = vector.extract_strided_slice %4 {offsets = [0, 48], sizes = [16, 16], strides = [1, 1]} : vector<16x96xf32> to vector<16x16xf32>
    %49 = vector.extract_strided_slice %34 {offsets = [0, 96], sizes = [16, 32], strides = [1, 1]} : vector<16x192xf32> to vector<16x32xf32>
    %cst_19 = arith.constant dense<0.000000e+00> : vector<16x32xf32>
    %50 = tpu.matmul %48, %49, %cst_19 {dimension_numbers = #tpu.dot_dimension_numbers<[1], [0], [0], [1], [0, 0, 1, 1], [], []>} : vector<16x16xf32>, vector<16x32xf32>, vector<16x32xf32> -> vector<16x32xf32>
    %51 = arith.addf %47, %50 : vector<16x32xf32>
    %52 = vector.extract_strided_slice %4 {offsets = [0, 64], sizes = [16, 16], strides = [1, 1]} : vector<16x96xf32> to vector<16x16xf32>
    %53 = vector.extract_strided_slice %34 {offsets = [0, 128], sizes = [16, 32], strides = [1, 1]} : vector<16x192xf32> to vector<16x32xf32>
    %cst_20 = arith.constant dense<0.000000e+00> : vector<16x32xf32>
    %54 = tpu.matmul %52, %53, %cst_20 {dimension_numbers = #tpu.dot_dimension_numbers<[1], [0], [0], [1], [0, 0, 1, 1], [], []>} : vector<16x16xf32>, vector<16x32xf32>, vector<16x32xf32> -> vector<16x32xf32>
    %55 = arith.addf %51, %54 : vector<16x32xf32>
    %56 = vector.extract_strided_slice %4 {offsets = [0, 80], sizes = [16, 16], strides = [1, 1]} : vector<16x96xf32> to vector<16x16xf32>
    %57 = vector.extract_strided_slice %34 {offsets = [0, 160], sizes = [16, 32], strides = [1, 1]} : vector<16x192xf32> to vector<16x32xf32>
    %cst_21 = arith.constant dense<0.000000e+00> : vector<16x32xf32>
    %58 = tpu.matmul %56, %57, %cst_21 {dimension_numbers = #tpu.dot_dimension_numbers<[1], [0], [0], [1], [0, 0, 1, 1], [], []>} : vector<16x16xf32>, vector<16x32xf32>, vector<16x32xf32> -> vector<16x32xf32>
    %59 = arith.addf %55, %58 : vector<16x32xf32>
    %60 = vector.broadcast %5 : vector<1x32xf32> to vector<16x32xf32>
    %61 = arith.addf %59, %60 : vector<16x32xf32>
    %62 = tpu.concatenate %33, %61 in 1 : vector<16x32xf32>, vector<16x32xf32> -> vector<16x64xf32>
    %c0_22 = arith.constant 0 : index
    %c0_23 = arith.constant 0 : index
    %c0_24 = arith.constant 0 : index
    %63 = vector.load %arg5[%c0_22, %c0_23, %c0_24] : memref<1x16x64xf32, #tpu.memory_space<vmem>>, vector<1x16x64xf32>
    %64 = vector.shape_cast %63 : vector<1x16x64xf32> to vector<16x64xf32>
    %65 = vector.shape_cast %62 : vector<16x64xf32> to vector<1x16x64xf32>
    tpu.vector_store %arg5[%c0_22, %c0_23, %c0_24], %65 {strides = array<i32>} : memref<1x16x64xf32, #tpu.memory_space<vmem>>, vector<1x16x64xf32>,
    return
  }
  func.func @transform_0(%arg0: i32) -> (i32, i32) {
    %c0_i32 = arith.constant 0 : i32
    %c0_i32_0 = arith.constant 0 : i32
    %c0_i32_1 = arith.constant 0 : i32
    return %c0_i32, %c0_i32_0 : i32, i32
  }
  func.func @transform_1(%arg0: i32) -> (i32, i32, i32) {
    %c0_i32 = arith.constant 0 : i32
    %c0_i32_0 = arith.constant 0 : i32
    %c0_i32_1 = arith.constant 0 : i32
    return %arg0, %c0_i32, %c0_i32_0 : i32, i32, i32
  }
  func.func @transform_2(%arg0: i32) -> (i32, i32) {
    %c0_i32 = arith.constant 0 : i32
    %c0_i32_0 = arith.constant 0 : i32
    %c0_i32_1 = arith.constant 0 : i32
    return %c0_i32, %c0_i32_0 : i32, i32
  }
  func.func @transform_3(%arg0: i32) -> (i32, i32) {
    %c0_i32 = arith.constant 0 : i32
    %c0_i32_0 = arith.constant 0 : i32
    %c0_i32_1 = arith.constant 0 : i32
    return %c0_i32, %c0_i32_0 : i32, i32
  }
  func.func @transform_4(%arg0: i32) -> (i32, i32, i32) {
    %c0_i32 = arith.constant 0 : i32
    %c0_i32_0 = arith.constant 0 : i32
    %c0_i32_1 = arith.constant 0 : i32
    return %arg0, %c0_i32, %c0_i32_0 : i32, i32, i32
  }
}

</mosaic_0001>

<bundles_post_ra>
// kernel: tpu_custom_call.1
= control target key start
LH: loop header
LB: loop body
LE: loop exit
PB: predicated region body
PF: predicated region fallthrough
CT: control target
= control target key end

     0   :  { %vm38_vm0 = vcmask 1043456   ;;  %v1390_v2 = vmov 0.0   ;;  %vm25_vm1 = vcmask 31744   ;;  %s1391_s21 = smov 112   ;;  %s1392_s22 = smov 96   ;;  %s1573_s0 = inlined_call_operand.vmem [shape: f32[16,96], index: 0, kind: input, shape index: {}]   ;;  %s1574_s1 = inlined_call_operand.vmem [shape: f32[2,16,4], index: 1, kind: input, shape index: {}]   ;;  %s1575_s2 = inlined_call_operand.vmem [shape: f32[4,192], index: 2, kind: input, shape index: {}]   ;;  %s1576_s3 = inlined_call_operand.vmem [shape: f32[1,32], index: 3, kind: input, shape index: {}]   ;;  %s1577_s4 = inlined_call_operand.hbm [shape: f32[1,16,64], index: 4, kind: output, shape index: {}]  }
   0x1   :  { %v22_v0 = vld [vmem:[%s1575_s2] sm:$0xff]  ;;  %107 = vmatprep.mubr.f32.mxu0 %v1390_v2 }
   0x2   :  { %v24_v1 = vcombine.high %v22_v0, %v22_v0  ;;  %v1431_v3 = vld [vmem:[%s1573_s0] sm:$0xff] }
   0x3   :  { %v18_v4 = vld [vmem:[%s1574_s1] sm:$0xff]  ;;  %137 = vrot.lane.b32.xlu1 %v1431_v3, %s1391_s21  ;;  %308 = vrot.lane.b32.xlu0 %v1431_v3, %s1392_s22 }
   0x4   :  { %9 = vsyncpa [#allocation3], 0  ;;  %1194 = vmatprep.subr.msk.mxu0 %vm38_vm0, %v24_v1  ;;  %v1442_v5 = vld [vmem:[%s1573_s0 + $0x8] sm:$0xff]  ;;  %s1393_s26 = smov 80   ;;  %v20_v7 = vld [vmem:[%s1574_s1 + $0x10] sm:$0xff]  ;;  %s1394_s0 = smov 64  }
   0x5   :  { %1195 = vmatpush1.msk.msra.mxu0 %vm38_vm0, %v22_v0  ;;  %v19_v6 = vld [vmem:[%s1574_s1 + $0x8] sm:$0xff]  ;;  %v21_v8 = vld [vmem:[%s1574_s1 + $0x18] sm:$0xff]  ;;  %s1395_s5 = smov 48   ;;  %vm149_vm2 = vcmask 130048   ;;  %s1396_s1 = smov 32   ;;  %vm1172_vm3 = vcmask 261120  }
   0x6   :  { %1196 = vmatmul.mubr.msk.f32.vlgmr.msra.gmra.mxu0 %vm25_vm1, %v18_v4  ;;  %v1212_v60 = vld [vmem:[%s1576_s3] ss:$0 sm:$0xff]  ;;  %s1397_s3 = smov [#allocation2]   ;;  %vm1175_vm4 = vcmask 523264  }
   0x7   :  { %113 = vmatprep.mubr.f32.mxu0 %v1390_v2  ;;  %139 = vrot.lane.b32.xlu1 %v1442_v5, %s1391_s21  ;;  %s1183_s8 = sshll.u32 %s1397_s3, 4  ;;  %s1184_s8 = int_to_ptr.vmem [resolvable:$true] %s1183_s8 }
   0x8   :  { %399 = vrot.lane.b32.xlu0 %v1431_v3, %s1393_s26  ;;  %s1368_s9 = scalar_lea.vmem %s1184_s8, 256  ;;  %p1373_p1 = scmp.lt.s32.totalorder %s1184_s8, %s1184_s8 }
   0x9   :  { %p1369_p0 = scmp.ne.s32.totalorder %s1184_s8, %s1368_s9  ;;  %p1374_p2 = scmp.lt.s32.totalorder %s1368_s9, %s1368_s9 }
   0xa   :  { %1197 = vmatmul.mubr.msk.f32.gmra.mxu0 %vm25_vm1, %v19_v6 }
   0xb   :  { %119 = vmatprep.mubr.f32.mxu0 %v1390_v2  ;;  %310 = vrot.lane.b32.xlu1 %v1442_v5, %s1392_s22  ;;  %p1375_p3 = por %p1374_p2, %p1373_p1 }
   0xc   :  { %492 = vrot.lane.b32.xlu0 %v1442_v5, %s1394_s0 }
   0xd   :  { %p1376_p4 = pnand %p1375_p3, %p1369_p0 }
   0xe   :  { %1198 = vmatmul.mubr.msk.f32.gmra.mxu0 %vm25_vm1, %v20_v7 }
   0xf   :  { %125 = vmatprep.mubr.f32.mxu0 %v1390_v2  ;;  %401 = vrot.lane.b32.xlu1 %v1442_v5, %s1393_s26 }
  0x10   :  { %577 = vrot.lane.b32.xlu0 %v1442_v5, %s1395_s5 }
  0x12   :  { %1199 = vmatmul.mubr.msk.f32.gmra.mxu0 %vm25_vm1, %v21_v8 }
  0x13   :  { %490 = vrot.lane.b32.xlu1 %v1431_v3, %s1394_s0 }
  0x17   :  { %575 = vrot.lane.b32.xlu1 %v1431_v3, %s1395_s5 }
  0x75   :  { %v138_v9 = vpop.permute.xlu1 %137  ;;  %v1479_v14 = vpop.permute.xlu0 %308 }
  0x76   :  { %1277 = vmatprep.mubr.msk.f32.mxu1 %vm149_vm2, %v138_v9 }
  0x79   :  { %v1469_v10 = vpop.permute.xlu1 %139 }
  0x7a   :  { %v1483_v17 = vpop.permute.xlu0 %399 }
  0x7d   :  { %v1471_v11 = vpop.permute.xlu1 %310 }
  0x7e   :  { %v1489_v20 = vpop.permute.xlu0 %492 }
  0x81   :  { %v1473_v12 = vpop.permute.xlu1 %401 }
  0x82   :  { %v1515_v25 = vpop.permute.xlu0 %577 }
  0x85   :  { %v1475_v13 = vpop.permute.xlu1 %490 }
  0x86   :  { %1305 = vmatprep.mubr.msk.f32.mxu0 %vm149_vm2, %v1475_v13 }
  0x89   :  { %v1517_v26 = vpop.permute.xlu1 %575 }
  0xc6   :  { %v109_v15 = vpop.f32.mrf.mxu0 }
  0xc7   :  { %312 = vrot.lane.b32.xlu1 %v109_v15, %s1394_s0  ;;  %143 = vrot.lane.b32.xlu0 %v109_v15, %s1392_s22 }
  0xc8   :  { %v111_v16 = vpop.f32.mrf.mxu0 }
  0xca   :  { %v115_v18 = vpop.f32.mrf.mxu0 }
  0xcb   :  { %403 = vrot.lane.b32.xlu1 %v109_v15, %s1396_s1  ;;  %145 = vrot.lane.b32.xlu0 %v115_v18, %s1392_s22 }
  0xcc   :  { %v117_v19 = vpop.f32.mrf.mxu0 }
  0xcd   :  { %1301 = vmatprep.subr.mxu0 %v117_v19 }
  0xce   :  { %1302 = vmatpush3.msra.mxu0 %v117_v19  ;;  %v1491_v21 = vpop.f32.mrf.mxu0 }
  0xcf   :  { %581 = vrot.lane.b32.xlu1 %v111_v16, %s1392_s22  ;;  %314 = vrot.lane.b32.xlu0 %v115_v18, %s1394_s0 }
  0xd0   :  { %1303 = vmatprep.subr.mxu0 %v111_v16  ;;  %v1499_v22 = vpop.f32.mrf.mxu0 }
  0xd1   :  { %1304 = vmatpush3.msra.mxu0 %v111_v16 }
  0xd2   :  { %1306 = vmatmul.mubr.msk.f32.vlgmr.msra.gmra.mxu0 %vm149_vm2, %v1489_v20  ;;  %v127_v23 = vpop.f32.mrf.mxu0 }
  0xd3   :  { %405 = vrot.lane.b32.xlu0 %v115_v18, %s1396_s1  ;;  %678 = vrot.lane.b32.xlu1 %v1491_v21, %s1392_s22 }
  0xd4   :  { %1319 = vmatprep.mubr.msk.f32.mxu0 %vm149_vm2, %v138_v9  ;;  %v1511_v24 = vpop.f32.mrf.mxu0 }
  0xd7   :  { %583 = vrot.lane.b32.xlu0 %v117_v19, %s1392_s22  ;;  %834 = vrot.lane.b32.xlu1 %v1491_v21, %s1394_s0 }
  0xdb   :  { %917 = vrot.lane.b32.xlu1 %v1491_v21, %s1396_s1  ;;  %680 = vrot.lane.b32.xlu0 %v127_v23, %s1392_s22 }
  0xdf   :  { %1079 = vrot.lane.b32.xlu1 %v1499_v22, %s1392_s22  ;;  %836 = vrot.lane.b32.xlu0 %v127_v23, %s1394_s0 }
  0xe3   :  { %919 = vrot.lane.b32.xlu0 %v127_v23, %s1396_s1 }
  0xe7   :  { %1081 = vrot.lane.b32.xlu0 %v1511_v24, %s1392_s22 }
 0x139   :  { %v144_v27 = vpop.permute.xlu0 %143  ;;  %v313_v28 = vpop.permute.xlu1 %312 }
 0x13d   :  { %v146_v29 = vpop.permute.xlu0 %145  ;;  %v404_v31 = vpop.permute.xlu1 %403 }
 0x13e   :  { %1273 = vmatprep.subr.mxu1 %v146_v29 }
 0x13f   :  { %1274 = vmatpush3.msra.mxu1 %v146_v29 }
 0x140   :  { %1275 = vmatprep.subr.mxu1 %v144_v27 }
 0x141   :  { %1276 = vmatpush3.msra.mxu1 %v144_v27  ;;  %v315_v30 = vpop.permute.xlu0 %314  ;;  %v582_v33 = vpop.permute.xlu1 %581 }
 0x142   :  { %1278 = vmatmul.mubr.msk.f32.vlgmr.msra.gmra.mxu1 %vm149_vm2, %v1469_v10  ;;  %1280 = vmatprep.subr.mxu1 %v115_v18 }
 0x143   :  { %1281 = vmatpush3.msra.mxu1 %v115_v18  ;;  %1284 = vmatprep.mubr.msk.f32.mxu1 %vm149_vm2, %v1431_v3 }
 0x144   :  { %1282 = vmatprep.subr.mxu1 %v109_v15 }
 0x145   :  { %1283 = vmatpush3.msra.mxu1 %v109_v15  ;;  %v406_v32 = vpop.permute.xlu0 %405  ;;  %v679_v36 = vpop.permute.xlu1 %678 }
 0x146   :  { %1285 = vmatmul.mubr.msk.f32.vlgmr.msra.gmra.mxu1 %vm149_vm2, %v1442_v5  ;;  %1287 = vmatprep.subr.mxu1 %v315_v30 }
 0x147   :  { %1288 = vmatpush3.msra.mxu1 %v315_v30  ;;  %1291 = vmatprep.mubr.msk.f32.mxu1 %vm149_vm2, %v1479_v14 }
 0x148   :  { %1289 = vmatprep.subr.mxu1 %v313_v28 }
 0x149   :  { %1290 = vmatpush3.msra.mxu1 %v313_v28  ;;  %v584_v34 = vpop.permute.xlu0 %583  ;;  %v835_v38 = vpop.permute.xlu1 %834 }
 0x14a   :  { %1292 = vmatmul.mubr.msk.f32.vlgmr.msra.gmra.mxu1 %vm149_vm2, %v1471_v11  ;;  %1294 = vmatprep.subr.mxu1 %v406_v32 }
 0x14b   :  { %1295 = vmatpush3.msra.mxu1 %v406_v32  ;;  %1298 = vmatprep.mubr.msk.f32.mxu1 %vm149_vm2, %v1483_v17 }
 0x14c   :  { %1296 = vmatprep.subr.mxu1 %v404_v31 }
 0x14d   :  { %1297 = vmatpush3.msra.mxu1 %v404_v31  ;;  %v681_v35 = vpop.permute.xlu0 %680  ;;  %v918_v40 = vpop.permute.xlu1 %917 }
 0x14e   :  { %1299 = vmatmul.mubr.msk.f32.vlgmr.msra.gmra.mxu1 %vm149_vm2, %v1473_v12  ;;  %1308 = vmatprep.subr.mxu1 %v584_v34 }
 0x14f   :  { %1315 = vmatprep.subr.mxu0 %v681_v35  ;;  %1309 = vmatpush3.msra.mxu1 %v584_v34 }
 0x150   :  { %1312 = vmatprep.mubr.msk.f32.mxu1 %vm149_vm2, %v1517_v26  ;;  %1316 = vmatpush3.msra.mxu0 %v681_v35 }
 0x151   :  { %1310 = vmatprep.subr.mxu1 %v582_v33  ;;  %1317 = vmatprep.subr.mxu0 %v679_v36  ;;  %v837_v37 = vpop.permute.xlu0 %836  ;;  %v1080_v42 = vpop.permute.xlu1 %1079 }
 0x152   :  { %1311 = vmatpush3.msra.mxu1 %v582_v33  ;;  %1318 = vmatpush3.msra.mxu0 %v679_v36 }
 0x153   :  { %1313 = vmatmul.mubr.msk.f32.vlgmr.msra.gmra.mxu1 %vm149_vm2, %v1515_v25  ;;  %1320 = vmatmul.mubr.msk.f32.vlgmr.msra.gmra.mxu0 %vm149_vm2, %v1469_v10 }
 0x154   :  { %1322 = vmatprep.subr.mxu1 %v127_v23  ;;  %1329 = vmatprep.subr.mxu0 %v837_v37 }
 0x155   :  { %1323 = vmatpush3.msra.mxu1 %v127_v23  ;;  %1330 = vmatpush3.msra.mxu0 %v837_v37  ;;  %v920_v39 = vpop.permute.xlu0 %919 }
 0x156   :  { %1333 = vmatprep.mubr.msk.f32.mxu0 %vm149_vm2, %v1479_v14  ;;  %1324 = vmatprep.subr.mxu1 %v1491_v21 }
 0x157   :  { %1331 = vmatprep.subr.mxu0 %v835_v38  ;;  %1326 = vmatprep.mubr.msk.f32.mxu1 %vm149_vm2, %v1431_v3 }
 0x158   :  { %1332 = vmatpush3.msra.mxu0 %v835_v38  ;;  %1325 = vmatpush3.msra.mxu1 %v1491_v21 }
 0x159   :  { %1327 = vmatmul.mubr.msk.f32.vlgmr.msra.gmra.mxu1 %vm149_vm2, %v1442_v5  ;;  %1334 = vmatmul.mubr.msk.f32.vlgmr.msra.gmra.mxu0 %vm149_vm2, %v1471_v11  ;;  %v1082_v41 = vpop.permute.xlu0 %1081 }
 0x15a   :  { %1336 = vmatprep.subr.mxu1 %v920_v39  ;;  %1343 = vmatprep.subr.mxu0 %v1511_v24 }
 0x15b   :  { %1337 = vmatpush3.msra.mxu1 %v920_v39  ;;  %1340 = vmatprep.mubr.msk.f32.mxu1 %vm149_vm2, %v1483_v17 }
 0x15c   :  { %1344 = vmatpush3.msra.mxu0 %v1511_v24  ;;  %1347 = vmatprep.mubr.msk.f32.mxu0 %vm149_vm2, %v1475_v13 }
 0x15d   :  { %1338 = vmatprep.subr.mxu1 %v918_v40  ;;  %1345 = vmatprep.subr.mxu0 %v1499_v22 }
 0x15e   :  { %1339 = vmatpush3.msra.mxu1 %v918_v40  ;;  %1346 = vmatpush3.msra.mxu0 %v1499_v22 }
 0x15f   :  { %1341 = vmatmul.mubr.msk.f32.vlgmr.msra.gmra.mxu1 %vm149_vm2, %v1473_v12  ;;  %1348 = vmatmul.mubr.msk.f32.vlgmr.msra.gmra.mxu0 %vm149_vm2, %v1489_v20 }
 0x160   :  { %1350 = vmatprep.subr.mxu1 %v1082_v41  ;;  %1354 = vmatprep.mubr.msk.f32.mxu1 %vm149_vm2, %v1517_v26 }
 0x161   :  { %1351 = vmatpush3.msra.mxu1 %v1082_v41 }
 0x162   :  { %1352 = vmatprep.subr.mxu1 %v1080_v42 }
 0x163   :  { %1353 = vmatpush3.msra.mxu1 %v1080_v42 }
 0x164   :  { %1355 = vmatmul.mubr.msk.f32.vlgmr.msra.gmra.mxu1 %vm149_vm2, %v1515_v25 }
 0x192   :  { %v1307_v52 = vpop.f32.mrf.mxu0 }
 0x194   :  { %v564_v57 = vpop.f32.mrf.mxu0 }
 0x202   :  { %v1279_v43 = vpop.f32.mrf.mxu1 }
 0x204   :  { %v220_v44 = vpop.f32.mrf.mxu1 }
 0x206   :  { %v1286_v45 = vpop.f32.mrf.mxu1 }
 0x207   :  { %v305_v46 = vadd.f32 %v1286_v45, %v1279_v43 }
 0x208   :  { %v299_v47 = vpop.f32.mrf.mxu1 }
 0x209   :  { %v300_v48 = vadd.f32 %v299_v47, %v220_v44 }
 0x20a   :  { %v1293_v49 = vpop.f32.mrf.mxu1 }
 0x20b   :  { %v398_v50 = vadd.f32 %v1293_v49, %v305_v46 }
 0x20c   :  { %v388_v51 = vpop.f32.mrf.mxu1 }
 0x20d   :  { %v397_v53 = vadd.f32 %v388_v51, %v300_v48 }
 0x20e   :  { %v1300_v54 = vpop.f32.mrf.mxu1 }
 0x20f   :  { %v489_v55 = vadd.f32 %v1300_v54, %v398_v50 }
 0x210   :  { %v479_v56 = vpop.f32.mrf.mxu1 }
 0x211   :  { %v488_v58 = vadd.f32 %v479_v56, %v397_v53  ;;  %v574_v59 = vadd.f32 %v1307_v52, %v489_v55 }
 0x213   :  { %v1314_v61 = vpop.f32.mrf.mxu1  ;;  %v1321_v62 = vpop.f32.mrf.mxu0  ;;  %v573_v63 = vadd.f32 %v564_v57, %v488_v58 }
 0x214   :  { %v667_v0 = vadd.f32 %v1314_v61, %v574_v59 }
 0x215   :  { %v657_v1 = vpop.f32.mrf.mxu1  ;;  %v750_v2 = vpop.f32.mrf.mxu0 }
 0x216   :  { %v675_v3 = vadd.f32 %v1212_v60, %v667_v0  ;;  %v666_v4 = vadd.f32 %v657_v1, %v573_v63 }
 0x218   :  { %v674_v5 = vadd.f32 %v1212_v60, %v666_v4 }
 0x219   :  { %v1328_v6 = vpop.f32.mrf.mxu1  ;;  %v1335_v7 = vpop.f32.mrf.mxu0 }
 0x21a   :  { %v831_v8 = vadd.f32 %v1328_v6, %v1321_v62 }
 0x21b   :  { %v825_v9 = vpop.f32.mrf.mxu1  ;;  %v906_v10 = vpop.f32.mrf.mxu0 }
 0x21c   :  { %v916_v11 = vadd.f32 %v1335_v7, %v831_v8  ;;  %v826_v12 = vadd.f32 %v825_v9, %v750_v2 }
 0x21e   :  { %v915_v13 = vadd.f32 %v906_v10, %v826_v12 }
 0x21f   :  { %v1342_v14 = vpop.f32.mrf.mxu1  ;;  %v1349_v15 = vpop.f32.mrf.mxu0 }
 0x220   :  { %v999_v16 = vadd.f32 %v1342_v14, %v916_v11 }
 0x221   :  { %v989_v17 = vpop.f32.mrf.mxu1  ;;  %v1066_v20 = vpop.f32.mrf.mxu0 }
 0x222   :  { %v1076_v18 = vadd.f32 %v1349_v15, %v999_v16  ;;  %v998_v19 = vadd.f32 %v989_v17, %v915_v13 }
 0x224   :  { %v1075_v21 = vadd.f32 %v1066_v20, %v998_v19  ;;  %v1356_v22 = vpop.f32.mrf.mxu1 }
 0x225   :  { %v1161_v23 = vadd.f32 %v1356_v22, %v1076_v18 }
 0x226   :  { %v1151_v24 = vpop.f32.mrf.mxu1 }
 0x227   :  { %v1163_v25 = vadd.f32 %v1212_v60, %v1161_v23  ;;  %v1160_v26 = vadd.f32 %v1151_v24, %v1075_v21 }
 0x229   :  { %v1162_v27 = vadd.f32 %v1212_v60, %v1160_v26  ;;  %1168 = vrot.lane.b32.xlu1 %v1163_v25, %s1396_s1 }
 0x22b   :  { %1166 = vrot.lane.b32.xlu0 %v1162_v27, %s1396_s1 }
 0x29b   :  { %v1169_v28 = vpop.permute.xlu1 %1168 }
 0x29c   :  { %v1174_v29 = vsel %vm1172_vm3, %v675_v3, %v1169_v28 }
 0x29d   :  { %1177 = vst.msk [vmem:[#allocation2 + $0x8] sm:$0xff] %vm1175_vm4, %v1174_v29  ;;  %v1167_v30 = vpop.permute.xlu0 %1166 }
 0x29e   :  { %v1173_v31 = vsel %vm1172_vm3, %v674_v5, %v1167_v30 }
 0x29f   :  { %1176 = vst.msk [vmem:[#allocation2] sm:$0xff] %vm1175_vm4, %v1173_v31 }
 0x2a0   :  { %1379 = shalt.err (!%p1376_p4)
}
 0x2a1   :  { %s1398_s10 = smov 128   ;;  %s1399_s11 = smov 8  }
 0x2a2   :  { %1189 = dma.vmem_to_hbm [thread:$0]  %s1184_s8, 256, %s1577_s4, [#allocation3], %s1398_s10, %s1398_s10, %s1399_s11  }
 0x2a3   :  { %1388 = dma.done.wait [#allocation3], 256  }
 0x2a4   :  { %1389 = vsyncadd [#allocation3], 4294967040 }
 0x2a5   :  { %1193 = vsyncpa [#allocation3], 1 }

</bundles_post_ra>
